<compile_context>
chip_gen: v5e
topology: v5e:2x2
jax: 0.10.0
libtpu: 0.0.40
codegen_flags: <defaults>
</compile_context>

<pallas_src>
import jax
import jax.numpy as jnp
from jax.experimental import pallas as pl
from jax.experimental.pallas import tpu as pltpu

GNN_LIST = ['gat', 'gcn', 'gin', 'cheb', 'sage', 'arma', 'graph', 'fc', 'skip']
EPS = 1e-5  # BatchNorm1d default eps


# ----------------------------------------------------------------------------- kernel
def _make_cell_kernel(pack):
    """Fused Cell forward for one row tile.

    consts rows (f32, shape (4, D)):
      0: scale1   1: shift1   2: b1f (= wb1*scale2 + shift2)   3: wb2
    w1 = (W1+I)*scale2, w2 = W2+I  (bf16 MXU operands, f32 accumulation).
    If pack > 1, `pack` result rows are packed into 128 lanes before the store
    (lane-dense output; wrapper undoes it with a free reshape).
    """
    def cell_kernel(x_ref, consts_ref, w1_ref, w2_ref, wfc_ref, bfc_ref, o_ref):
        x = x_ref[...].astype(jnp.float32)          # bf16 inputs upcast on-chip
        c = consts_ref[...]                          # (4, D) f32

        # node 1: BN1(eval) -> ReLU
        h1 = jnp.maximum(x * c[0:1, :] + c[1:2, :], 0.0)
        # node 2 input: relu(BN2(n1)) == relu(h1 @ (W1+I)*scale2 + b1f)  (BN2 pre-folded)
        h2 = jnp.maximum(
            jnp.dot(h1.astype(w1_ref.dtype), w1_ref[...],
                    preferred_element_type=jnp.float32) + c[2:3, :], 0.0)
        # node 2: LinearConv + SkipConv  (skip folded into W2+I)
        n2 = jnp.dot(h2.astype(w2_ref.dtype), w2_ref[...],
                     preferred_element_type=jnp.float32) + c[3:4, :]
        # output head: out = [F, F, T] so cat(res) == n2 ; ReLU ; final Linear
        fin = jnp.maximum(n2, 0.0)
        out = jnp.dot(fin.astype(wfc_ref.dtype), wfc_ref[...],
                      preferred_element_type=jnp.float32) + bfc_ref[...]

        if pack > 1:
            rows, od = out.shape
            out = out.reshape(rows // pack, od * pack)   # lane-dense (.., 128) slab
        o_ref[...] = out.astype(o_ref.dtype)

    return cell_kernel


# ----------------------------------------------------------------------------- folding
def _fold_params(p, D, mxu_dtype=jnp.bfloat16):
    """Fold BN1/BN2 + skip identity into scale/shift/weights; cast weights for the MXU."""
    scale1 = p["g1"] * jax.lax.rsqrt(p["v1"] + EPS)
    shift1 = p["b1"] - p["m1"] * scale1
    scale2 = p["g2"] * jax.lax.rsqrt(p["v2"] + EPS)
    shift2 = p["b2"] - p["m2"] * scale2

    eye = jnp.eye(D, dtype=jnp.float32)
    w1f = ((p["W1"] + eye) * scale2).astype(mxu_dtype)   # (D, D), columns scaled by scale2
    b1f = p["wb1"] * scale2 + shift2                      # (1, D)
    w2f = (p["W2"] + eye).astype(mxu_dtype)               # (D, D)

    consts = jnp.concatenate([scale1, shift1, b1f, p["wb2"]],
                             axis=0).astype(jnp.float32)  # (4, D)
    wfc = p["Wfc"].astype(mxu_dtype)                       # (D, out_dim)
    bfc = p["bfc"].astype(jnp.float32)                     # (1, out_dim)
    return consts, w1f, w2f, wfc, bfc


# ----------------------------------------------------------------------------- tiling
def _auto_tile(N, D, row_align, itemsize):
    """Pick (tile_n, row_pad).

    Targets ~1 MiB of x per grid step (amortizes the ~0.35 us fixed per-step cost even
    at v7x HBM bandwidth), keeps the double-buffered x tile well inside the scoped VMEM
    budget, keeps >= 2 grid steps when N allows (v7x has two TensorCores and the grid
    axis is 'parallel'), and prefers divisors of N (padding rows only as a last resort).
    """
    if N < max(2 * row_align, 512):
        return N, 0                                     # single step over the full array
    target = max(512, (1 << 20) // (itemsize * D))      # ~1 MiB of x per step
    target = min(target, (12 << 20) // (2 * itemsize * D))   # dbl-buffered x-tile cap
    target = min(target, N // 2)                        # >= 2 steps for v7x's 2 TCs
    target = max(row_align, target - target % row_align)
    best = 0
    t = row_align
    while t <= target:                                  # largest aligned divisor of N
        if N % t == 0:
            best = t
        t += row_align
    if best:
        return best, 0
    return target, (-N) % target                        # pad rows; sliced off afterwards


# ----------------------------------------------------------------------------- wrapper
def cell_forward(x, params, out_dim, tile_n=None, lane_dense=True):
    """x: [N, D] float32 or bfloat16. params: raw (un-folded) Cell parameters."""
    N, D = x.shape
    consts, w1, w2, wfc, bfc = _fold_params(params, D)

    # lane-dense packing factor: pack rows per 128-lane output row
    pack = 128 // out_dim if (lane_dense and out_dim <= 128 and 128 % out_dim == 0) else 1
    itemsize = x.dtype.itemsize
    row_align = max(8 * pack, 16 if itemsize < 4 else 8)

    if tile_n is None:
        tile_n, pad = _auto_tile(N, D, row_align, itemsize)
    else:
        pad = (-N) % tile_n
    Np = N + pad
    if tile_n < Np and tile_n % row_align:
        raise ValueError(f"tile_n={tile_n} must be a multiple of {row_align}")
    if Np % pack or tile_n % pack:
        pack = 1                                        # fall back to masked-store layout

    xp = jnp.pad(x, ((0, pad), (0, 0))) if pad else x
    grid = (Np // tile_n,)

    def build_and_call(pack):
        if pack > 1:
            out_shape = jax.ShapeDtypeStruct((Np // pack, out_dim * pack), jnp.float32)
            out_spec = pl.BlockSpec((tile_n // pack, out_dim * pack), lambda i: (i, 0))
        else:
            out_shape = jax.ShapeDtypeStruct((Np, out_dim), jnp.float32)
            out_spec = pl.BlockSpec((tile_n, out_dim), lambda i: (i, 0))
        # constant index_map -> weights/consts stay resident in VMEM across all steps
        full = lambda shape: pl.BlockSpec(shape, lambda i: (0, 0))
        return pl.pallas_call(
            _make_cell_kernel(pack),
            out_shape=out_shape,
            grid_spec=pltpu.PrefetchScalarGridSpec(
                num_scalar_prefetch=0,
                grid=grid,
                in_specs=[
                    pl.BlockSpec((tile_n, D), lambda i: (i, 0)),  # x row tile
                    full((4, D)),                                 # stacked scale/shift/bias
                    full((D, D)), full((D, D)),                   # (W1+I)*scale2, W2+I (bf16)
                    full((D, out_dim)), full((1, out_dim)),       # Wfc (bf16), bfc (f32)
                ],
                out_specs=out_spec,
            ),
            compiler_params=pltpu.CompilerParams(
                dimension_semantics=("parallel",),
                # explicit scoped-VMEM budget (default is 32 MiB on v6e/v7x, 16 MiB on
                # v5e); tile selection keeps data well below this on every generation.
                vmem_limit_bytes=48 * 1024 * 1024,
            ),
        )(xp, consts, w1, w2, wfc, bfc)

    out = None
    if pack > 1:
        try:
            # lane-dense slab -> original layout is a pure row-major reshape (free)
            out = build_and_call(pack).reshape(Np, out_dim)
        except Exception:
            # TODO(synk): the in-kernel (tile_n, out_dim) -> (tile_n//pack, 128) reshape
            # is version-dependent in Mosaic; fall back to the masked-store layout.
            out = None
    if out is None:
        out = build_and_call(1)
    return out[:N] if pad else out


# ----------------------------------------------------------------------------- references
def reference_forward_f32(x, p):
    """Exact f32 PyTorch semantics (eval mode), high-precision matmuls."""
    hi = jax.lax.Precision.HIGHEST
    h1 = (x - p["m1"]) / jnp.sqrt(p["v1"] + EPS) * p["g1"] + p["b1"]
    h1 = jnp.maximum(h1, 0.0)
    n1 = jnp.dot(h1, p["W1"], precision=hi) + p["wb1"] + h1
    h2 = (n1 - p["m2"]) / jnp.sqrt(p["v2"] + EPS) * p["g2"] + p["b2"]
    h2 = jnp.maximum(h2, 0.0)
    n2 = jnp.dot(h2, p["W2"], precision=hi) + p["wb2"] + h2
    return jnp.dot(jnp.maximum(n2, 0.0), p["Wfc"], precision=hi) + p["bfc"]


def reference_forward_matched(x, p):
    """Same folded / bf16-operand math as the kernel, expressed as plain XLA ops."""
    D = x.shape[1]
    consts, w1, w2, wfc, bfc = _fold_params(p, D)
    xf = x.astype(jnp.float32)
    h1 = jnp.maximum(xf * consts[0:1] + consts[1:2], 0.0)
    h2 = jnp.maximum(
        jnp.dot(h1.astype(w1.dtype), w1, preferred_element_type=jnp.float32) + consts[2:3],
        0.0)
    n2 = jnp.dot(h2.astype(w2.dtype), w2, preferred_element_type=jnp.float32) + consts[3:4]
    fin = jnp.maximum(n2, 0.0)
    return jnp.dot(fin.astype(wfc.dtype), wfc, preferred_element_type=jnp.float32) + bfc


# ----------------------------------------------------------------------------- demo
if __name__ == "__main__":
    D, OUT_DIM = 32, 16                 # hp.dim, out_dim
    link = [0, 1]
    # keep_mask: per intermediate node keep only the 'fc' and 'skip' ops (static; baked
    # into the kernel structure above).
    keep_mask = ([False] * 7 + [True, True]) * len(link)
    # TODO(synk): gat/gcn/gin/cheb/sage/arma/graph branches of gnn_map are external
    # torch_geometric message-passing layers (not defined in the source); keep_mask is
    # fc/skip only, so edge_index is unused.

    key = jax.random.PRNGKey(0)
    ks = jax.random.split(key, 12)

    params = {
        # BatchNorm1d (eval mode): affine + running stats
        "g1": 1.0 + 0.05 * jax.random.normal(ks[1], (1, D), jnp.float32),
        "b1": 0.05 * jax.random.normal(ks[2], (1, D), jnp.float32),
        "m1": 0.10 * jax.random.normal(ks[3], (1, D), jnp.float32),
        "v1": 1.0 + 0.10 * jax.random.uniform(ks[3], (1, D), jnp.float32),
        "g2": 1.0 + 0.05 * jax.random.normal(ks[4], (1, D), jnp.float32),
        "b2": 0.05 * jax.random.normal(ks[5], (1, D), jnp.float32),
        "m2": 0.10 * jax.random.normal(ks[6], (1, D), jnp.float32),
        "v2": 1.0 + 0.10 * jax.random.uniform(ks[6], (1, D), jnp.float32),
        # LinearConv weights (stored as [in, out], i.e. transposed nn.Linear.weight)
        "W1": 0.1 * jax.random.normal(ks[7], (D, D), jnp.float32),
        "wb1": 0.01 * jax.random.normal(ks[7], (1, D), jnp.float32),
        "W2": 0.1 * jax.random.normal(ks[8], (D, D), jnp.float32),
        "wb2": 0.01 * jax.random.normal(ks[8], (1, D), jnp.float32),
        # final self.fc: (sum(out) * hp.dim = D) -> out_dim
        "Wfc": 0.1 * jax.random.normal(ks[9], (D, OUT_DIM), jnp.float32),
        "bfc": 0.01 * jax.random.normal(ks[9], (1, OUT_DIM), jnp.float32),
    }

    # N=16: primary small demo (grid=1); N=1024: multi-step grid + lane-dense alignment;
    # N=1000: exercises the row-padding path (no aligned divisor).
    for N in (16, 1024, 1000):
        kx = jax.random.fold_in(ks[0], N)
        x = jax.random.normal(kx, (N, D), dtype=jnp.float32)

        out = jax.block_until_ready(cell_forward(x, params, OUT_DIM))
        assert out.shape == (N, OUT_DIM)

        # Tight check: identical folded/bf16-operand math, only accumulation order differs.
        ref_matched = reference_forward_matched(x, params)
        assert jnp.allclose(out, ref_matched, atol=1e-3, rtol=1e-3), \
            f"mismatch vs matched (bf16-operand) reference at N={N}"

        # Semantics check vs exact f32 PyTorch math; tolerance covers the intentional
        # bf16 MXU-operand (incl. folded '+I' skip diagonal) precision change.
        ref_f32 = reference_forward_f32(x, params)
        assert jnp.allclose(out, ref_f32, atol=1e-1, rtol=1e-1), \
            f"mismatch vs f32 reference at N={N}"

    print("KERNEL_OK")
</pallas_src>

<mosaic_0001>
module attributes {stable_mosaic.version = 11 : i64} {
  func.func @cell_kernel(%arg0: i32, %arg1: memref<16x32xf32, #tpu.memory_space<vmem>>, %arg2: memref<4x32xf32, #tpu.memory_space<vmem>>, %arg3: memref<32x32xbf16, #tpu.memory_space<vmem>>, %arg4: memref<32x32xbf16, #tpu.memory_space<vmem>>, %arg5: memref<32x16xbf16, #tpu.memory_space<vmem>>, %arg6: memref<1x16xf32, #tpu.memory_space<vmem>>, %arg7: memref<2x128xf32, #tpu.memory_space<vmem>>) attributes {dimension_semantics = [#tpu.dimension_semantics<parallel>], iteration_bounds = array<i64: 1>, scalar_prefetch = 0 : i64, scratch_operands = 0 : i64, tpu.core_type = #tpu.core_type<tc>, window_params = [{transform_indices = @transform_0, window_bounds = array<i64: 16, 32>}, {pipeline_mode = #tpu.pipeline_mode<synchronous>, transform_indices = @transform_1, window_bounds = array<i64: 4, 32>}, {pipeline_mode = #tpu.pipeline_mode<synchronous>, transform_indices = @transform_2, window_bounds = array<i64: 32, 32>}, {pipeline_mode = #tpu.pipeline_mode<synchronous>, transform_indices = @transform_3, window_bounds = array<i64: 32, 32>}, {pipeline_mode = #tpu.pipeline_mode<synchronous>, transform_indices = @transform_4, window_bounds = array<i64: 32, 16>}, {pipeline_mode = #tpu.pipeline_mode<synchronous>, transform_indices = @transform_5, window_bounds = array<i64: 1, 16>}, {transform_indices = @transform_6, window_bounds = array<i64: 2, 128>}]} {
    %c0 = arith.constant 0 : index
    %c0_0 = arith.constant 0 : index
    %0 = vector.load %arg1[%c0, %c0_0] : memref<16x32xf32, #tpu.memory_space<vmem>>, vector<16x32xf32>
    %c0_1 = arith.constant 0 : index
    %c0_2 = arith.constant 0 : index
    %1 = vector.load %arg2[%c0_1, %c0_2] : memref<4x32xf32, #tpu.memory_space<vmem>>, vector<4x32xf32>
    %2 = vector.extract_strided_slice %1 {offsets = [0, 0], sizes = [1, 32], strides = [1, 1]} : vector<4x32xf32> to vector<1x32xf32>
    %3 = vector.broadcast %2 : vector<1x32xf32> to vector<16x32xf32>
    %4 = arith.mulf %0, %3 : vector<16x32xf32>
    %5 = vector.extract_strided_slice %1 {offsets = [1, 0], sizes = [1, 32], strides = [1, 1]} : vector<4x32xf32> to vector<1x32xf32>
    %6 = vector.broadcast %5 : vector<1x32xf32> to vector<16x32xf32>
    %7 = arith.addf %4, %6 : vector<16x32xf32>
    %cst = arith.constant 0.000000e+00 : f32
    %8 = vector.broadcast %cst : f32 to vector<16x32xf32>
    %9 = arith.maximumf %7, %8 : vector<16x32xf32>
    %10 = arith.truncf %9 : vector<16x32xf32> to vector<16x32xbf16>
    %c0_3 = arith.constant 0 : index
    %c0_4 = arith.constant 0 : index
    %11 = vector.load %arg3[%c0_3, %c0_4] : memref<32x32xbf16, #tpu.memory_space<vmem>>, vector<32x32xbf16>
    %cst_5 = arith.constant dense<0.000000e+00> : vector<16x32xf32>
    %12 = tpu.matmul %10, %11, %cst_5 {dimension_numbers = #tpu.dot_dimension_numbers<[1], [0], [0], [1], [0, 0, 1, 1], [], []>} : vector<16x32xbf16>, vector<32x32xbf16>, vector<16x32xf32> -> vector<16x32xf32>
    %13 = vector.extract_strided_slice %1 {offsets = [2, 0], sizes = [1, 32], strides = [1, 1]} : vector<4x32xf32> to vector<1x32xf32>
    %14 = vector.broadcast %13 : vector<1x32xf32> to vector<16x32xf32>
    %15 = arith.addf %12, %14 : vector<16x32xf32>
    %cst_6 = arith.constant 0.000000e+00 : f32
    %16 = vector.broadcast %cst_6 : f32 to vector<16x32xf32>
    %17 = arith.maximumf %15, %16 : vector<16x32xf32>
    %18 = arith.truncf %17 : vector<16x32xf32> to vector<16x32xbf16>
    %c0_7 = arith.constant 0 : index
    %c0_8 = arith.constant 0 : index
    %19 = vector.load %arg4[%c0_7, %c0_8] : memref<32x32xbf16, #tpu.memory_space<vmem>>, vector<32x32xbf16>
    %cst_9 = arith.constant dense<0.000000e+00> : vector<16x32xf32>
    %20 = tpu.matmul %18, %19, %cst_9 {dimension_numbers = #tpu.dot_dimension_numbers<[1], [0], [0], [1], [0, 0, 1, 1], [], []>} : vector<16x32xbf16>, vector<32x32xbf16>, vector<16x32xf32> -> vector<16x32xf32>
    %21 = vector.extract_strided_slice %1 {offsets = [3, 0], sizes = [1, 32], strides = [1, 1]} : vector<4x32xf32> to vector<1x32xf32>
    %22 = vector.broadcast %21 : vector<1x32xf32> to vector<16x32xf32>
    %23 = arith.addf %20, %22 : vector<16x32xf32>
    %cst_10 = arith.constant 0.000000e+00 : f32
    %24 = vector.broadcast %cst_10 : f32 to vector<16x32xf32>
    %25 = arith.maximumf %23, %24 : vector<16x32xf32>
    %26 = arith.truncf %25 : vector<16x32xf32> to vector<16x32xbf16>
    %c0_11 = arith.constant 0 : index
    %c0_12 = arith.constant 0 : index
    %27 = vector.load %arg5[%c0_11, %c0_12] : memref<32x16xbf16, #tpu.memory_space<vmem>>, vector<32x16xbf16>
    %cst_13 = arith.constant dense<0.000000e+00> : vector<16x16xf32>
    %28 = tpu.matmul %26, %27, %cst_13 {dimension_numbers = #tpu.dot_dimension_numbers<[1], [0], [0], [1], [0, 0, 1, 1], [], []>} : vector<16x32xbf16>, vector<32x16xbf16>, vector<16x16xf32> -> vector<16x16xf32>
    %c0_14 = arith.constant 0 : index
    %c0_15 = arith.constant 0 : index
    %29 = vector.load %arg6[%c0_14, %c0_15] : memref<1x16xf32, #tpu.memory_space<vmem>>, vector<1x16xf32>
    %30 = vector.broadcast %29 : vector<1x16xf32> to vector<16x16xf32>
    %31 = arith.addf %28, %30 : vector<16x16xf32>
    %32 = vector.shape_cast %31 : vector<16x16xf32> to vector<2x128xf32>
    %c0_16 = arith.constant 0 : index
    %c0_17 = arith.constant 0 : index
    %33 = vector.load %arg7[%c0_16, %c0_17] : memref<2x128xf32, #tpu.memory_space<vmem>>, vector<2x128xf32>
    tpu.vector_store %arg7[%c0_16, %c0_17], %32 {strides = array<i32>} : memref<2x128xf32, #tpu.memory_space<vmem>>, vector<2x128xf32>,
    return
  }
  func.func @transform_0(%arg0: i32) -> (i32, i32) {
    %c0_i32 = arith.constant 0 : i32
    %c0_i32_0 = arith.constant 0 : i32
    return %arg0, %c0_i32 : i32, i32
  }
  func.func @transform_1(%arg0: i32) -> (i32, i32) {
    %c0_i32 = arith.constant 0 : i32
    %c0_i32_0 = arith.constant 0 : i32
    %c0_i32_1 = arith.constant 0 : i32
    return %c0_i32, %c0_i32_0 : i32, i32
  }
  func.func @transform_2(%arg0: i32) -> (i32, i32) {
    %c0_i32 = arith.constant 0 : i32
    %c0_i32_0 = arith.constant 0 : i32
    %c0_i32_1 = arith.constant 0 : i32
    return %c0_i32, %c0_i32_0 : i32, i32
  }
  func.func @transform_3(%arg0: i32) -> (i32, i32) {
    %c0_i32 = arith.constant 0 : i32
    %c0_i32_0 = arith.constant 0 : i32
    %c0_i32_1 = arith.constant 0 : i32
    return %c0_i32, %c0_i32_0 : i32, i32
  }
  func.func @transform_4(%arg0: i32) -> (i32, i32) {
    %c0_i32 = arith.constant 0 : i32
    %c0_i32_0 = arith.constant 0 : i32
    %c0_i32_1 = arith.constant 0 : i32
    return %c0_i32, %c0_i32_0 : i32, i32
  }
  func.func @transform_5(%arg0: i32) -> (i32, i32) {
    %c0_i32 = arith.constant 0 : i32
    %c0_i32_0 = arith.constant 0 : i32
    %c0_i32_1 = arith.constant 0 : i32
    return %c0_i32, %c0_i32_0 : i32, i32
  }
  func.func @transform_6(%arg0: i32) -> (i32, i32) {
    %c0_i32 = arith.constant 0 : i32
    %c0_i32_0 = arith.constant 0 : i32
    return %arg0, %c0_i32 : i32, i32
  }
}

module attributes {stable_mosaic.version = 11 : i64} {
  func.func @cell_kernel(%arg0: i32, %arg1: memref<16x32xf32, #tpu.memory_space<vmem>>, %arg2: memref<4x32xf32, #tpu.memory_space<vmem>>, %arg3: memref<32x32xbf16, #tpu.memory_space<vmem>>, %arg4: memref<32x32xbf16, #tpu.memory_space<vmem>>, %arg5: memref<32x16xbf16, #tpu.memory_space<vmem>>, %arg6: memref<1x16xf32, #tpu.memory_space<vmem>>, %arg7: memref<16x16xf32, #tpu.memory_space<vmem>>) attributes {dimension_semantics = [#tpu.dimension_semantics<parallel>], iteration_bounds = array<i64: 1>, scalar_prefetch = 0 : i64, scratch_operands = 0 : i64, tpu.core_type = #tpu.core_type<tc>, window_params = [{transform_indices = @transform_0, window_bounds = array<i64: 16, 32>}, {pipeline_mode = #tpu.pipeline_mode<synchronous>, transform_indices = @transform_1, window_bounds = array<i64: 4, 32>}, {pipeline_mode = #tpu.pipeline_mode<synchronous>, transform_indices = @transform_2, window_bounds = array<i64: 32, 32>}, {pipeline_mode = #tpu.pipeline_mode<synchronous>, transform_indices = @transform_3, window_bounds = array<i64: 32, 32>}, {pipeline_mode = #tpu.pipeline_mode<synchronous>, transform_indices = @transform_4, window_bounds = array<i64: 32, 16>}, {pipeline_mode = #tpu.pipeline_mode<synchronous>, transform_indices = @transform_5, window_bounds = array<i64: 1, 16>}, {transform_indices = @transform_6, window_bounds = array<i64: 16, 16>}]} {
    %c0 = arith.constant 0 : index
    %c0_0 = arith.constant 0 : index
    %0 = vector.load %arg1[%c0, %c0_0] : memref<16x32xf32, #tpu.memory_space<vmem>>, vector<16x32xf32>
    %c0_1 = arith.constant 0 : index
    %c0_2 = arith.constant 0 : index
    %1 = vector.load %arg2[%c0_1, %c0_2] : memref<4x32xf32, #tpu.memory_space<vmem>>, vector<4x32xf32>
    %2 = vector.extract_strided_slice %1 {offsets = [0, 0], sizes = [1, 32], strides = [1, 1]} : vector<4x32xf32> to vector<1x32xf32>
    %3 = vector.broadcast %2 : vector<1x32xf32> to vector<16x32xf32>
    %4 = arith.mulf %0, %3 : vector<16x32xf32>
    %5 = vector.extract_strided_slice %1 {offsets = [1, 0], sizes = [1, 32], strides = [1, 1]} : vector<4x32xf32> to vector<1x32xf32>
    %6 = vector.broadcast %5 : vector<1x32xf32> to vector<16x32xf32>
    %7 = arith.addf %4, %6 : vector<16x32xf32>
    %cst = arith.constant 0.000000e+00 : f32
    %8 = vector.broadcast %cst : f32 to vector<16x32xf32>
    %9 = arith.maximumf %7, %8 : vector<16x32xf32>
    %10 = arith.truncf %9 : vector<16x32xf32> to vector<16x32xbf16>
    %c0_3 = arith.constant 0 : index
    %c0_4 = arith.constant 0 : index
    %11 = vector.load %arg3[%c0_3, %c0_4] : memref<32x32xbf16, #tpu.memory_space<vmem>>, vector<32x32xbf16>
    %cst_5 = arith.constant dense<0.000000e+00> : vector<16x32xf32>
    %12 = tpu.matmul %10, %11, %cst_5 {dimension_numbers = #tpu.dot_dimension_numbers<[1], [0], [0], [1], [0, 0, 1, 1], [], []>} : vector<16x32xbf16>, vector<32x32xbf16>, vector<16x32xf32> -> vector<16x32xf32>
    %13 = vector.extract_strided_slice %1 {offsets = [2, 0], sizes = [1, 32], strides = [1, 1]} : vector<4x32xf32> to vector<1x32xf32>
    %14 = vector.broadcast %13 : vector<1x32xf32> to vector<16x32xf32>
    %15 = arith.addf %12, %14 : vector<16x32xf32>
    %cst_6 = arith.constant 0.000000e+00 : f32
    %16 = vector.broadcast %cst_6 : f32 to vector<16x32xf32>
    %17 = arith.maximumf %15, %16 : vector<16x32xf32>
    %18 = arith.truncf %17 : vector<16x32xf32> to vector<16x32xbf16>
    %c0_7 = arith.constant 0 : index
    %c0_8 = arith.constant 0 : index
    %19 = vector.load %arg4[%c0_7, %c0_8] : memref<32x32xbf16, #tpu.memory_space<vmem>>, vector<32x32xbf16>
    %cst_9 = arith.constant dense<0.000000e+00> : vector<16x32xf32>
    %20 = tpu.matmul %18, %19, %cst_9 {dimension_numbers = #tpu.dot_dimension_numbers<[1], [0], [0], [1], [0, 0, 1, 1], [], []>} : vector<16x32xbf16>, vector<32x32xbf16>, vector<16x32xf32> -> vector<16x32xf32>
    %21 = vector.extract_strided_slice %1 {offsets = [3, 0], sizes = [1, 32], strides = [1, 1]} : vector<4x32xf32> to vector<1x32xf32>
    %22 = vector.broadcast %21 : vector<1x32xf32> to vector<16x32xf32>
    %23 = arith.addf %20, %22 : vector<16x32xf32>
    %cst_10 = arith.constant 0.000000e+00 : f32
    %24 = vector.broadcast %cst_10 : f32 to vector<16x32xf32>
    %25 = arith.maximumf %23, %24 : vector<16x32xf32>
    %26 = arith.truncf %25 : vector<16x32xf32> to vector<16x32xbf16>
    %c0_11 = arith.constant 0 : index
    %c0_12 = arith.constant 0 : index
    %27 = vector.load %arg5[%c0_11, %c0_12] : memref<32x16xbf16, #tpu.memory_space<vmem>>, vector<32x16xbf16>
    %cst_13 = arith.constant dense<0.000000e+00> : vector<16x16xf32>
    %28 = tpu.matmul %26, %27, %cst_13 {dimension_numbers = #tpu.dot_dimension_numbers<[1], [0], [0], [1], [0, 0, 1, 1], [], []>} : vector<16x32xbf16>, vector<32x16xbf16>, vector<16x16xf32> -> vector<16x16xf32>
    %c0_14 = arith.constant 0 : index
    %c0_15 = arith.constant 0 : index
    %29 = vector.load %arg6[%c0_14, %c0_15] : memref<1x16xf32, #tpu.memory_space<vmem>>, vector<1x16xf32>
    %30 = vector.broadcast %29 : vector<1x16xf32> to vector<16x16xf32>
    %31 = arith.addf %28, %30 : vector<16x16xf32>
    %c0_16 = arith.constant 0 : index
    %c0_17 = arith.constant 0 : index
    %32 = vector.load %arg7[%c0_16, %c0_17] : memref<16x16xf32, #tpu.memory_space<vmem>>, vector<16x16xf32>
    tpu.vector_store %arg7[%c0_16, %c0_17], %31 {strides = array<i32>} : memref<16x16xf32, #tpu.memory_space<vmem>>, vector<16x16xf32>,
    return
  }
  func.func @transform_0(%arg0: i32) -> (i32, i32) {
    %c0_i32 = arith.constant 0 : i32
    %c0_i32_0 = arith.constant 0 : i32
    return %arg0, %c0_i32 : i32, i32
  }
  func.func @transform_1(%arg0: i32) -> (i32, i32) {
    %c0_i32 = arith.constant 0 : i32
    %c0_i32_0 = arith.constant 0 : i32
    %c0_i32_1 = arith.constant 0 : i32
    return %c0_i32, %c0_i32_0 : i32, i32
  }
  func.func @transform_2(%arg0: i32) -> (i32, i32) {
    %c0_i32 = arith.constant 0 : i32
    %c0_i32_0 = arith.constant 0 : i32
    %c0_i32_1 = arith.constant 0 : i32
    return %c0_i32, %c0_i32_0 : i32, i32
  }
  func.func @transform_3(%arg0: i32) -> (i32, i32) {
    %c0_i32 = arith.constant 0 : i32
    %c0_i32_0 = arith.constant 0 : i32
    %c0_i32_1 = arith.constant 0 : i32
    return %c0_i32, %c0_i32_0 : i32, i32
  }
  func.func @transform_4(%arg0: i32) -> (i32, i32) {
    %c0_i32 = arith.constant 0 : i32
    %c0_i32_0 = arith.constant 0 : i32
    %c0_i32_1 = arith.constant 0 : i32
    return %c0_i32, %c0_i32_0 : i32, i32
  }
  func.func @transform_5(%arg0: i32) -> (i32, i32) {
    %c0_i32 = arith.constant 0 : i32
    %c0_i32_0 = arith.constant 0 : i32
    %c0_i32_1 = arith.constant 0 : i32
    return %c0_i32, %c0_i32_0 : i32, i32
  }
  func.func @transform_6(%arg0: i32) -> (i32, i32) {
    %c0_i32 = arith.constant 0 : i32
    %c0_i32_0 = arith.constant 0 : i32
    return %arg0, %c0_i32 : i32, i32
  }
}

</mosaic_0001>

<bundles_post_ra>
// kernel: tpu_custom_call.1
= control target key start
LH: loop header
LB: loop body
LE: loop exit
PB: predicated region body
PF: predicated region fallthrough
CT: control target
= control target key end

     0   :  { %11 = vsyncpa [#allocation3], 0  ;;  %s395_s0 = inlined_call_operand.vmem [shape: f32[16,32], index: 0, kind: input, shape index: {}]   ;;  %s396_s1 = inlined_call_operand.vmem [shape: f32[4,32], index: 1, kind: input, shape index: {}]   ;;  %s397_s2 = inlined_call_operand.hbm [shape: bf16[32,32], index: 2, kind: input, shape index: {}]   ;;  %s398_s3 = inlined_call_operand.hbm [shape: bf16[32,32], index: 3, kind: input, shape index: {}]   ;;  %s399_s4 = inlined_call_operand.vmem [shape: bf16[32,16], index: 4, kind: input, shape index: {}]   ;;  %s400_s5 = inlined_call_operand.vmem [shape: f32[1,16], index: 5, kind: input, shape index: {}]   ;;  %s401_s6 = inlined_call_operand.hbm [shape: f32[16,16], index: 6, kind: output, shape index: {}]  }
   0x1   :  { %12 = vsyncpa [#allocation6], 0 }
   0x2   :  { %13 = vsyncpa [#allocation4], 0  ;;  %s22_s23 = sshll.u32 %s397_s2, 4  ;;  %s323_s24 = smov [#allocation2]   ;;  %s23_s23 = int_to_ptr.hbm [resolvable:$true] %s22_s23 }
   0x3   :  { %s24_s25 = sshll.u32 %s323_s24, 4  ;;  %s35_s28 = sshll.u32 %s398_s3, 4  ;;  %s25_s25 = int_to_ptr.vmem [resolvable:$true] %s24_s25  ;;  %s36_s28 = int_to_ptr.hbm [resolvable:$true] %s35_s28 }
   0x4   :  { %s324_s29 = smov 64   ;;  %s325_s30 = smov 4  }
   0x5   :  { %30 = dma.hbm_to_vmem [thread:$0]  %s23_s23, 256, %s25_s25, [#allocation3], %s324_s29, %s324_s29, %s325_s30  }
   0x6   :  { %s326_s7 = smov [#allocation5]  }
   0x7   :  { %s37_s8 = sshll.u32 %s326_s7, 4  ;;  %s38_s8 = int_to_ptr.vmem [resolvable:$true] %s37_s8 }
   0x8   :  { %43 = dma.hbm_to_vmem [thread:$0]  %s36_s28, 256, %s38_s8, [#allocation6], %s324_s29, %s324_s29, %s325_s30  }
   0x9   :  { %317 = dma.done.wait [#allocation3], 256  }
   0xa   :  { %318 = vsyncadd [#allocation3], 4294967040 }
   0xb   :  { %319 = dma.done.wait [#allocation6], 256  }
   0xc   :  { %320 = vsyncadd [#allocation6], 4294967040  ;;  %v232_v0 = vld [vmem:[#allocation2 + $0x8] sm:$0xff]  ;;  %v57_v1 = vld [vmem:[%s395_s0] sm:$0xff]  ;;  %vm86_vm0 = vcmask 261120   ;;  %vm181_vm1 = vcmask 130048  }
   0xd   :  { %v58_v2 = vld [vmem:[%s395_s0 + $0x8] sm:$0xff]  ;;  %v59_v3 = vld [vmem:[%s396_s1] sm:$0xf]  ;;  %96 = vmatpush.bf16.msra.mxu0 %v232_v0  ;;  %v234_v14 = vld [vmem:[#allocation5 + $0x8] sm:$0xff]  ;;  %s190_s20 = sshll.u32 %s401_s6, 4  ;;  %s328_s21 = smov 128   ;;  %s191_s20 = int_to_ptr.hbm [resolvable:$true] %s190_s20 }
   0xe   :  { %v231_v4 = vld [vmem:[#allocation2] sm:$0xff]  ;;  %v60_v5 = vperm.slane %v59_v3, 0  ;;  %v63_v6 = vperm.slane %v59_v3, 1  ;;  %133 = vmatpush.bf16.msra.mxu1 %v234_v14  ;;  %v233_v15 = vld [vmem:[#allocation5] sm:$0xff]  ;;  %v73_v17 = vperm.slane %v59_v3, 2  ;;  %v236_v24 = vld [vmem:[%s399_s4 + $0x8] sm:$0xff] }
   0xf   :  { %173 = vmatpush.bf16.msra.mxu2 %v236_v24  ;;  %v235_v25 = vld [vmem:[%s399_s4] sm:$0xff]  ;;  %v111_v27 = vperm.slane %v59_v3, 3  ;;  %s327_s4 = smov [#allocation7]   ;;  %s329_s22 = smov 8  }
  0x10   :  { %v61_v7 = vmul.f32 %v60_v5, %v57_v1  ;;  %v62_v8 = vmul.f32 %v60_v5, %v58_v2  ;;  %v244_v34 = vld [vmem:[%s400_s5] ss:$0 sm:$0xff]  ;;  %s188_s17 = sshll.u32 %s327_s4, 4  ;;  %s189_s17 = int_to_ptr.vmem [resolvable:$true] %s188_s17 }
  0x11   :  { %97 = vmatpush.bf16.msra.mxu0 %v231_v4 }
  0x12   :  { %v64_v9 = vadd.f32 %v63_v6, %v61_v7  ;;  %v65_v10 = vadd.f32 %v63_v6, %v62_v8  ;;  %134 = vmatpush.bf16.msra.mxu1 %v233_v15 }
  0x13   :  { %174 = vmatpush.bf16.msra.mxu2 %v235_v25 }
  0x14   :  { %v66_v11 = vmax.f32 %v64_v9, 0.0  ;;  %v67_v12 = vmax.f32 %v65_v10, 0.0 }
  0x16   :  { %v68_v13 = vpack.c.bf16 %v67_v12, %v66_v11 }
  0x18   :  { %212 = vmatmul.msk.bf16.vlgmr.msra.gmra.mxu0 %vm86_vm0, %v68_v13 }
  0x95   :  { %v99_v16 = vpop.f32.mrf.mxu0 }
  0x96   :  { %v100_v18 = vadd.f32 %v99_v16, %v73_v17 }
  0x98   :  { %v104_v21 = vmax.f32 %v100_v18, 0.0 }
  0x9d   :  { %v101_v19 = vpop.f32.mrf.mxu0 }
  0x9e   :  { %v102_v20 = vadd.f32 %v101_v19, %v73_v17 }
  0xa0   :  { %v105_v22 = vmax.f32 %v102_v20, 0.0 }
  0xa2   :  { %v106_v23 = vpack.c.bf16 %v105_v22, %v104_v21 }
  0xa4   :  { %221 = vmatmul.msk.bf16.vlgmr.msra.gmra.mxu1 %vm86_vm0, %v106_v23 }
 0x121   :  { %v136_v26 = vpop.f32.mrf.mxu1 }
 0x122   :  { %v137_v28 = vadd.f32 %v136_v26, %v111_v27 }
 0x124   :  { %v141_v31 = vmax.f32 %v137_v28, 0.0 }
 0x129   :  { %v138_v29 = vpop.f32.mrf.mxu1 }
 0x12a   :  { %v139_v30 = vadd.f32 %v138_v29, %v111_v27 }
 0x12c   :  { %v142_v32 = vmax.f32 %v139_v30, 0.0 }
 0x12e   :  { %v143_v33 = vpack.c.bf16 %v142_v32, %v141_v31 }
 0x130   :  { %230 = vmatmul.msk.bf16.vlgmr.msra.gmra.mxu2 %vm86_vm0, %v143_v33 }
 0x1b3   :  { %v176_v35 = vpop.f32.mrf.mxu2 }
 0x1b4   :  { %v177_v36 = vadd.f32 %v244_v34, %v176_v35 }
 0x1b6   :  { %182 = vst.msk [vmem:[#allocation7] sm:$0xff] %vm181_vm1, %v177_v36 }
 0x1bb   :  { %v178_v37 = vpop.f32.mrf.mxu2 }
 0x1bc   :  { %v179_v38 = vadd.f32 %v244_v34, %v178_v37 }
 0x1be   :  { %183 = vst.msk [vmem:[#allocation7 + $0x8] sm:$0xff] %vm181_vm1, %v179_v38 }
 0x1bf   :  { %196 = dma.vmem_to_hbm [thread:$0]  %s189_s17, 256, %s191_s20, [#allocation4], %s328_s21, %s328_s21, %s329_s22  }
 0x1c0   :  { %321 = dma.done.wait [#allocation4], 256  }
 0x1c1   :  { %322 = vsyncadd [#allocation4], 4294967040 }
 0x1c2   :  { %201 = vsyncpa [#allocation3], 1 }
 0x1c3   :  { %202 = vsyncpa [#allocation6], 1 }
 0x1c4   :  { %203 = vsyncpa [#allocation4], 1 }

</bundles_post_ra>
